<compile_context>
chip_gen: v5e
topology: v5e:2x2
jax: 0.10.0
libtpu: 0.0.40
codegen_flags: <defaults>
</compile_context>

<pallas_src>
import functools
import math

import jax
import jax.numpy as jnp
from jax.experimental import pallas as pl
from jax.experimental.pallas import tpu as pltpu


# --------------------------------------------------------------------------
# Kernels
# --------------------------------------------------------------------------

def _noisy_linear_train_kernel(x_ref, w_ref, ein_ref, bias_ref, o_ref, *,
                               compute_dtype):
    """Training path.

    x_ref:    (b_pad, i_pad)        activation, resident across the grid
    w_ref:    (2, i_pad, tile_o)    packed [W_mu^T ; W_sigma^T], storage dtype
    ein_ref:  (i_pad, 1)  f32       eps_in as a column
    bias_ref: (3, tile_o) f32       packed rows [bias_mu ; bias_sigma ; eps_out]
    """
    # Upcast after the (possibly bf16) DMA: HBM bytes already got the savings;
    # the factored-noise FMA stays f32 (v5e has no bf16 VPU path).
    wmu = w_ref[0].astype(jnp.float32)                # (i_pad, tile_o)
    wsig = w_ref[1].astype(jnp.float32)               # (i_pad, tile_o)
    bp = bias_ref[...]
    eps_out_row = bp[2:3, :]                          # (1, tile_o)
    eps_in_col = ein_ref[...]                         # (i_pad, 1)

    # Factored noise built on the VPU (hidden under the weight DMA):
    w = wmu + wsig * (eps_in_col * eps_out_row)       # (i_pad, tile_o), f32
    b = bp[0:1, :] + bp[1:2, :] * eps_out_row         # (1, tile_o),     f32

    # Weights are pre-transposed [I, O] so the MXU gets its native [K, N]
    # operand — plain x @ w, no in-kernel transpose.
    x = x_ref[...].astype(compute_dtype)
    y = jnp.dot(x, w.astype(compute_dtype), preferred_element_type=jnp.float32)
    o_ref[...] = (y + b).astype(o_ref.dtype)


def _noisy_linear_eval_kernel(x_ref, w_ref, bmu_ref, o_ref, *, compute_dtype):
    """Eval path: y = x @ W_mu^T + b_mu.  Streams only the mu slab."""
    x = x_ref[...].astype(compute_dtype)
    w = w_ref[0].astype(compute_dtype)                # (i_pad, tile_o)
    y = jnp.dot(x, w, preferred_element_type=jnp.float32)
    o_ref[...] = (y + bmu_ref[...]).astype(o_ref.dtype)


# --------------------------------------------------------------------------
# Tiling / chip helpers
# --------------------------------------------------------------------------

def _round_up(n, m):
    return ((n + m - 1) // m) * m


def _pad2(a, rows, cols):
    return jnp.pad(a, ((0, rows - a.shape[0]), (0, cols - a.shape[1])))


def _tpu_chip_info():
    """Best-effort (VMEM capacity bytes, TensorCores per chip); safe fallbacks."""
    vmem_cap = 64 * 1024 * 1024          # conservative: v7x per-TC VMEM
    num_cores = 1
    try:
        info = pltpu.get_tpu_info()
        vmem_cap = int(getattr(info, "vmem_capacity_bytes", vmem_cap))
    except Exception:
        pass
    try:
        kind = jax.devices()[0].device_kind.lower()
        if "v7" in kind or "7x" in kind:
            num_cores = 2                # v7x: 2 TensorCores per chip
    except Exception:
        pass
    return vmem_cap, num_cores


def _footprint_bytes(tile_o, i_pad, b_pad, w_bytes, x_bytes):
    """Per-core VMEM footprint for one grid step (double-buffered operands)."""
    w = 2 * (2 * tile_o * i_pad * w_bytes)   # packed [mu; sigma] weight stream
    xb = 2 * (b_pad * i_pad * x_bytes)       # resident activation
    ob = 2 * (b_pad * tile_o * 4)            # output tile
    eps = 2 * (i_pad * 128 * 4)              # eps_in column (lane-padded)
    bias = 2 * (8 * tile_o * 4)              # packed bias rows (sublane-padded)
    return w + xb + ob + eps + bias


def _select_tile_o(o_pad128, i_pad, b_pad, w_bytes, x_bytes, budget, num_cores):
    """Largest lane-dense tile_o fitting the VMEM budget.

    Minimises padded output width first (wasted weight DMA), then grid steps.
    On multi-TC chips (v7x) prefers a tile count that is a multiple of the
    core count so the 'parallel' grid axis keeps both cores streaming.
    """
    def pick(require_core_multiple):
        best = None
        for t in range(128, o_pad128 + 1, 128):
            o_pad = _round_up(o_pad128, t)
            n = o_pad // t
            if require_core_multiple and n % num_cores != 0:
                continue
            if _footprint_bytes(t, i_pad, b_pad, w_bytes, x_bytes) > budget:
                continue
            key = (o_pad, n)
            if best is None or key < best[0]:
                best = (key, t, o_pad)
        return None if best is None else (best[1], best[2])

    sel = pick(num_cores > 1) or pick(False)
    if sel is None:                          # nothing fits: smallest legal tile
        sel = (128, _round_up(o_pad128, 128))
    return sel


# --------------------------------------------------------------------------
# Parameter preparation (one-time) + forward wrappers
# --------------------------------------------------------------------------

def prepare_noisy_linear(weight_mu, weight_sigma, bias_mu, bias_sigma,
                         eps_in, eps_out, *, weight_dtype=None, tile_o=None,
                         batch_hint=8, vmem_limit_bytes=None):
    """One-time packing of parameters + noise into a kernel-ready HBM layout.

    * Weights transposed to [I, O] and packed as one [2, I, O] operand so each
      grid step issues a single double-buffered weight DMA in MXU-native layout.
    * `weight_dtype=jnp.bfloat16` casts the weight stream BEFORE the DMA,
      halving HBM traffic on this weight-bandwidth-bound kernel (noise FMA and
      accumulation stay f32 inside the kernel).
    * tile_o sized to the per-chip VMEM budget; even tile count on v7x.

    Re-run after every reset_noise / optimizer step (it is cheap XLA work and
    amortised across all forward calls that reuse the result).
    """
    O, I = weight_mu.shape
    w_dtype = jnp.dtype(weight_dtype) if weight_dtype is not None \
        else jnp.dtype(weight_mu.dtype)
    i_pad = _round_up(I, 128)
    o_pad128 = _round_up(O, 128)
    b_pad_hint = _round_up(max(int(batch_hint), 1), 8)

    vmem_cap, num_cores = _tpu_chip_info()
    if vmem_limit_bytes is None:
        # <= ~48 MiB scoped on v7x (64 MiB physical); up to 96 MiB on v5e/v6e.
        vmem_limit_bytes = min(vmem_cap * 3 // 4, 96 * 1024 * 1024)
    budget = int(0.7 * vmem_limit_bytes)

    w_bytes = w_dtype.itemsize
    if tile_o is None:
        tile_o, o_pad = _select_tile_o(o_pad128, i_pad, b_pad_hint, w_bytes, 4,
                                       budget, num_cores)
    else:
        tile_o = min(_round_up(int(tile_o), 128), o_pad128)
        o_pad = _round_up(o_pad128, tile_o)

    # MXU-native [I, O] layout; mu/sigma packed; dtype cast happens here,
    # before the DMA, so HBM bytes actually shrink.
    wmu_t = _pad2(weight_mu.T.astype(w_dtype), i_pad, o_pad)
    wsig_t = _pad2(weight_sigma.T.astype(w_dtype), i_pad, o_pad)
    w_pack = jnp.stack([wmu_t, wsig_t], axis=0)                   # (2, i_pad, o_pad)

    eps_in_col = _pad2(eps_in.reshape(I, 1).astype(jnp.float32), i_pad, 1)
    bias_pack = _pad2(
        jnp.stack([bias_mu, bias_sigma, eps_out], axis=0).astype(jnp.float32),
        3, o_pad)                                                 # (3, o_pad)
    bias_mu_row = _pad2(bias_mu.reshape(1, O).astype(jnp.float32), 1, o_pad)

    # TODO(synk): int8 eval-weight path (per-output-column scales) for v5e/v6e
    # would cut eval weight bytes another 2x vs bf16; not applicable on v7x
    # (fp8-only MXU), so it is left out of this generation-portable version.

    return dict(
        in_features=I, out_features=O,
        i_pad=i_pad, o_pad=o_pad, tile_o=tile_o,
        vmem_limit_bytes=int(vmem_limit_bytes),
        compute_dtype=w_dtype,
        w_pack=w_pack, eps_in_col=eps_in_col,
        bias_pack=bias_pack, bias_mu_row=bias_mu_row,
    )


def noisy_linear_prepared(x, prep, *, training=True):
    """Forward pass using parameters packed by prepare_noisy_linear."""
    B, I = x.shape
    assert I == prep["in_features"], "in_features mismatch"
    O = prep["out_features"]
    i_pad, o_pad, tile_o = prep["i_pad"], prep["o_pad"], prep["tile_o"]
    b_pad = _round_up(B, 8)
    xp = _pad2(x, b_pad, i_pad)

    grid = (o_pad // tile_o,)
    out_shape = jax.ShapeDtypeStruct((b_pad, o_pad), x.dtype)
    out_specs = pl.BlockSpec((b_pad, tile_o), lambda j: (0, j))
    cparams = pltpu.CompilerParams(
        dimension_semantics=("parallel",),
        vmem_limit_bytes=prep["vmem_limit_bytes"],
    )
    compute_dtype = prep["compute_dtype"]

    if training:
        kernel = functools.partial(_noisy_linear_train_kernel,
                                   compute_dtype=compute_dtype)
        yp = pl.pallas_call(
            kernel,
            out_shape=out_shape,
            grid=grid,
            in_specs=[
                pl.BlockSpec((b_pad, i_pad), lambda j: (0, 0)),        # x (resident)
                pl.BlockSpec((2, i_pad, tile_o), lambda j: (0, 0, j)), # [Wmu^T;Wsig^T]
                pl.BlockSpec((i_pad, 1), lambda j: (0, 0)),            # eps_in column
                pl.BlockSpec((3, tile_o), lambda j: (0, j)),           # bias pack
            ],
            out_specs=out_specs,
            compiler_params=cparams,
        )(xp, prep["w_pack"], prep["eps_in_col"], prep["bias_pack"])
    else:
        kernel = functools.partial(_noisy_linear_eval_kernel,
                                   compute_dtype=compute_dtype)
        yp = pl.pallas_call(
            kernel,
            out_shape=out_shape,
            grid=grid,
            in_specs=[
                pl.BlockSpec((b_pad, i_pad), lambda j: (0, 0)),        # x (resident)
                pl.BlockSpec((1, i_pad, tile_o), lambda j: (0, 0, j)), # Wmu^T slab only
                pl.BlockSpec((1, tile_o), lambda j: (0, j)),           # bias_mu row
            ],
            out_specs=out_specs,
            compiler_params=cparams,
        )(xp, prep["w_pack"], prep["bias_mu_row"])

    return yp[:B, :O]


def noisy_linear(x, weight_mu, weight_sigma, eps_in, eps_out, bias_mu,
                 bias_sigma, *, training=True, weight_dtype=None, tile_o=None):
    """Convenience wrapper: prepare + apply (use the split API in real code)."""
    prep = prepare_noisy_linear(weight_mu, weight_sigma, bias_mu, bias_sigma,
                                eps_in, eps_out, weight_dtype=weight_dtype,
                                tile_o=tile_o, batch_hint=x.shape[0])
    return noisy_linear_prepared(x, prep, training=training)


# --------------------------------------------------------------------------
# Parameter / noise init mirroring NoisyLinear.__init__ + reset_noise
# --------------------------------------------------------------------------

def _scale_noise(key, size):
    x = jax.random.normal(key, (size,), dtype=jnp.float32)
    return jnp.sign(x) * jnp.sqrt(jnp.abs(x))


def init_noisy_linear_params(key, in_features, out_features, std_init=0.4):
    k_wmu, k_bmu, k_ein, k_eout = jax.random.split(key, 4)
    mu_range = 1.0 / math.sqrt(in_features)

    weight_mu = jax.random.uniform(
        k_wmu, (out_features, in_features), minval=-mu_range, maxval=mu_range,
        dtype=jnp.float32)
    weight_sigma = jnp.full((out_features, in_features),
                            std_init / math.sqrt(in_features), dtype=jnp.float32)
    bias_mu = jax.random.uniform(
        k_bmu, (out_features,), minval=-mu_range, maxval=mu_range,
        dtype=jnp.float32)
    bias_sigma = jnp.full((out_features,),
                          std_init / math.sqrt(out_features), dtype=jnp.float32)

    # Factored noise (reset_noise): weight_epsilon == outer(eps_out, eps_in),
    # bias_epsilon == eps_out.  Only the factors are stored / streamed.
    eps_in = _scale_noise(k_ein, in_features)
    eps_out = _scale_noise(k_eout, out_features)

    return dict(weight_mu=weight_mu, weight_sigma=weight_sigma,
                bias_mu=bias_mu, bias_sigma=bias_sigma,
                eps_in=eps_in, eps_out=eps_out)


def _reference(x, p, training=True):
    if training:
        w_eps = jnp.outer(p["eps_out"], p["eps_in"])
        w = p["weight_mu"] + p["weight_sigma"] * w_eps
        b = p["bias_mu"] + p["bias_sigma"] * p["eps_out"]
    else:
        w, b = p["weight_mu"], p["bias_mu"]
    return x @ w.T + b


# TODO(synk): for full Rainbow-DQN speed, fuse adjacent NoisyLinear layers
# (+ ReLU + dueling heads) into a single pallas_call keeping activations in
# VMEM scratch; this script implements the single-layer module only.

if __name__ == "__main__":
    key = jax.random.PRNGKey(0)
    k_param, k_x, k_param2, k_x2 = jax.random.split(key, 4)

    # Lane-dense shapes; auto-tiling picks one tile (v5e/v6e) or two (v7x).
    B, I, O = 8, 128, 256
    params = init_noisy_linear_params(k_param, I, O)
    x = jax.random.normal(k_x, (B, I), dtype=jnp.float32)
    ref_train = _reference(x, params, training=True)
    ref_eval = _reference(x, params, training=False)

    # (a) Training-mode forward, auto tile selection, f32 weights.
    y_train = noisy_linear(x, params["weight_mu"], params["weight_sigma"],
                           params["eps_in"], params["eps_out"],
                           params["bias_mu"], params["bias_sigma"],
                           training=True)
    y_train = jax.block_until_ready(y_train)
    assert jnp.allclose(y_train, ref_train, atol=1e-5, rtol=1e-5)

    # (b) Forced multi-tile grid: exercises the pipelined weight stream.
    y_train_2t = noisy_linear(x, params["weight_mu"], params["weight_sigma"],
                              params["eps_in"], params["eps_out"],
                              params["bias_mu"], params["bias_sigma"],
                              training=True, tile_o=128)
    y_train_2t = jax.block_until_ready(y_train_2t)
    assert jnp.allclose(y_train_2t, ref_train, atol=1e-5, rtol=1e-5)

    # (c) Eval-mode forward (mu-only weight stream).
    y_eval = noisy_linear(x, params["weight_mu"], params["weight_sigma"],
                          params["eps_in"], params["eps_out"],
                          params["bias_mu"], params["bias_sigma"],
                          training=False)
    y_eval = jax.block_until_ready(y_eval)
    assert jnp.allclose(y_eval, ref_eval, atol=1e-5, rtol=1e-5)

    # (d) Unaligned shapes exercise the padding path.
    B2, I2, O2 = 5, 100, 50
    params2 = init_noisy_linear_params(k_param2, I2, O2)
    x2 = jax.random.normal(k_x2, (B2, I2), dtype=jnp.float32)
    y2 = noisy_linear(x2, params2["weight_mu"], params2["weight_sigma"],
                      params2["eps_in"], params2["eps_out"],
                      params2["bias_mu"], params2["bias_sigma"],
                      training=True)
    y2 = jax.block_until_ready(y2)
    assert y2.shape == (B2, O2)
    assert jnp.allclose(y2, _reference(x2, params2, training=True),
                        atol=1e-5, rtol=1e-5)

    # (e) bf16-in-HBM weights: cast happens BEFORE the DMA (halves the dominant
    #     weight traffic).  Compare against a reference built from the same
    #     bf16-quantized weights (remaining error = bf16 MXU operands only).
    y_bf16 = noisy_linear(x, params["weight_mu"], params["weight_sigma"],
                          params["eps_in"], params["eps_out"],
                          params["bias_mu"], params["bias_sigma"],
                          training=True, weight_dtype=jnp.bfloat16)
    y_bf16 = jax.block_until_ready(y_bf16)
    params_q = dict(params)
    params_q["weight_mu"] = params["weight_mu"].astype(jnp.bfloat16).astype(jnp.float32)
    params_q["weight_sigma"] = params["weight_sigma"].astype(jnp.bfloat16).astype(jnp.float32)
    ref_q = _reference(x, params_q, training=True)
    assert jnp.allclose(y_bf16, ref_q, atol=5e-2, rtol=5e-2)

    print("KERNEL_OK")
</pallas_src>

<mosaic_0001>
module attributes {stable_mosaic.version = 11 : i64} {
  func.func @_noisy_linear_train_kernel(%arg0: i32, %arg1: memref<8x128xf32, #tpu.memory_space<vmem>>, %arg2: memref<2x128x256xf32, #tpu.memory_space<vmem>>, %arg3: memref<128x1xf32, #tpu.memory_space<vmem>>, %arg4: memref<3x256xf32, #tpu.memory_space<vmem>>, %arg5: memref<8x256xf32, #tpu.memory_space<vmem>>) attributes {dimension_semantics = [#tpu.dimension_semantics<parallel>], iteration_bounds = array<i64: 1>, scalar_prefetch = 0 : i64, scratch_operands = 0 : i64, tpu.core_type = #tpu.core_type<tc>, window_params = [{pipeline_mode = #tpu.pipeline_mode<synchronous>, transform_indices = @transform_0, window_bounds = array<i64: 8, 128>}, {transform_indices = @transform_1, window_bounds = array<i64: 2, 128, 256>}, {pipeline_mode = #tpu.pipeline_mode<synchronous>, transform_indices = @transform_2, window_bounds = array<i64: 128, 1>}, {transform_indices = @transform_3, window_bounds = array<i64: 3, 256>}, {transform_indices = @transform_4, window_bounds = array<i64: 8, 256>}]} {
    %c0 = arith.constant 0 : index
    %c0_0 = arith.constant 0 : index
    %c0_1 = arith.constant 0 : index
    %0 = vector.load %arg2[%c0, %c0_0, %c0_1] : memref<2x128x256xf32, #tpu.memory_space<vmem>>, vector<1x128x256xf32>
    %1 = vector.shape_cast %0 : vector<1x128x256xf32> to vector<128x256xf32>
    %c1 = arith.constant 1 : index
    %c0_2 = arith.constant 0 : index
    %c0_3 = arith.constant 0 : index
    %2 = vector.load %arg2[%c1, %c0_2, %c0_3] : memref<2x128x256xf32, #tpu.memory_space<vmem>>, vector<1x128x256xf32>
    %3 = vector.shape_cast %2 : vector<1x128x256xf32> to vector<128x256xf32>
    %c0_4 = arith.constant 0 : index
    %c0_5 = arith.constant 0 : index
    %4 = vector.load %arg4[%c0_4, %c0_5] : memref<3x256xf32, #tpu.memory_space<vmem>>, vector<3x256xf32>
    %5 = vector.extract_strided_slice %4 {offsets = [2, 0], sizes = [1, 256], strides = [1, 1]} : vector<3x256xf32> to vector<1x256xf32>
    %c0_6 = arith.constant 0 : index
    %c0_7 = arith.constant 0 : index
    %6 = vector.load %arg3[%c0_6, %c0_7] : memref<128x1xf32, #tpu.memory_space<vmem>>, vector<128x1xf32>
    %7 = vector.broadcast %6 : vector<128x1xf32> to vector<128x256xf32>
    %8 = vector.broadcast %5 : vector<1x256xf32> to vector<128x256xf32>
    %9 = arith.mulf %7, %8 : vector<128x256xf32>
    %10 = arith.mulf %3, %9 : vector<128x256xf32>
    %11 = arith.addf %1, %10 : vector<128x256xf32>
    %12 = vector.extract_strided_slice %4 {offsets = [0, 0], sizes = [1, 256], strides = [1, 1]} : vector<3x256xf32> to vector<1x256xf32>
    %13 = vector.extract_strided_slice %4 {offsets = [1, 0], sizes = [1, 256], strides = [1, 1]} : vector<3x256xf32> to vector<1x256xf32>
    %14 = arith.mulf %13, %5 : vector<1x256xf32>
    %15 = arith.addf %12, %14 : vector<1x256xf32>
    %c0_8 = arith.constant 0 : index
    %c0_9 = arith.constant 0 : index
    %16 = vector.load %arg1[%c0_8, %c0_9] : memref<8x128xf32, #tpu.memory_space<vmem>>, vector<8x128xf32>
    %cst = arith.constant dense<0.000000e+00> : vector<8x256xf32>
    %17 = tpu.matmul %16, %11, %cst {dimension_numbers = #tpu.dot_dimension_numbers<[1], [0], [0], [1], [0, 0, 1, 1], [], []>} : vector<8x128xf32>, vector<128x256xf32>, vector<8x256xf32> -> vector<8x256xf32>
    %18 = vector.broadcast %15 : vector<1x256xf32> to vector<8x256xf32>
    %19 = arith.addf %17, %18 : vector<8x256xf32>
    %c0_10 = arith.constant 0 : index
    %c0_11 = arith.constant 0 : index
    %20 = vector.load %arg5[%c0_10, %c0_11] : memref<8x256xf32, #tpu.memory_space<vmem>>, vector<8x256xf32>
    tpu.vector_store %arg5[%c0_10, %c0_11], %19 {strides = array<i32>} : memref<8x256xf32, #tpu.memory_space<vmem>>, vector<8x256xf32>,
    return
  }
  func.func @transform_0(%arg0: i32) -> (i32, i32) {
    %c0_i32 = arith.constant 0 : i32
    %c0_i32_0 = arith.constant 0 : i32
    %c0_i32_1 = arith.constant 0 : i32
    return %c0_i32, %c0_i32_0 : i32, i32
  }
  func.func @transform_1(%arg0: i32) -> (i32, i32, i32) {
    %c0_i32 = arith.constant 0 : i32
    %c0_i32_0 = arith.constant 0 : i32
    %c0_i32_1 = arith.constant 0 : i32
    return %c0_i32, %c0_i32_0, %arg0 : i32, i32, i32
  }
  func.func @transform_2(%arg0: i32) -> (i32, i32) {
    %c0_i32 = arith.constant 0 : i32
    %c0_i32_0 = arith.constant 0 : i32
    %c0_i32_1 = arith.constant 0 : i32
    return %c0_i32, %c0_i32_0 : i32, i32
  }
  func.func @transform_3(%arg0: i32) -> (i32, i32) {
    %c0_i32 = arith.constant 0 : i32
    %c0_i32_0 = arith.constant 0 : i32
    return %c0_i32, %arg0 : i32, i32
  }
  func.func @transform_4(%arg0: i32) -> (i32, i32) {
    %c0_i32 = arith.constant 0 : i32
    %c0_i32_0 = arith.constant 0 : i32
    return %c0_i32, %arg0 : i32, i32
  }
}

</mosaic_0001>

<bundles_post_ra>
// kernel: tpu_custom_call.1
= control target key start
LH: loop header
LB: loop body
LE: loop exit
PB: predicated region body
PF: predicated region fallthrough
CT: control target
= control target key end

     0   :  { %9 = vsyncpa [#allocation3], 0  ;;  %s570_s0 = inlined_call_operand.vmem [shape: f32[8,128], index: 0, kind: input, shape index: {}]   ;;  %s571_s1 = inlined_call_operand.hbm [shape: f32[2,128,256], index: 1, kind: input, shape index: {}]   ;;  %s572_s2 = inlined_call_operand.vmem [shape: f32[128,1], index: 2, kind: input, shape index: {}]   ;;  %s573_s3 = inlined_call_operand.vmem [shape: f32[3,256], index: 3, kind: input, shape index: {}]   ;;  %s574_s4 = inlined_call_operand.hbm [shape: f32[8,256], index: 4, kind: output, shape index: {}]  }
   0x1   :  { %10 = vsyncpa [#allocation4], 0  ;;  %s17_s17 = sshll.u32 %s571_s1, 4  ;;  %s437_s18 = smov [#allocation2]   ;;  %s18_s17 = int_to_ptr.hbm [resolvable:$true] %s17_s17 }
   0x2   :  { %s19_s19 = sshll.u32 %s437_s18, 4  ;;  %s438_s20 = smov 256   ;;  %s20_s19 = int_to_ptr.vmem [resolvable:$true] %s19_s19 }
   0x3   :  { %s439_s21 = smov 16  }
   0x4   :  { %25 = dma.hbm_to_vmem [thread:$0]  %s18_s17, 8192, %s20_s19, [#allocation3], %s438_s20, %s438_s20, %s439_s21  }
   0x5   :  { %433 = dma.done.wait [#allocation3], 8192  }
   0x6   :  { %434 = vsyncadd [#allocation3], 4294959104  ;;  %v440_v0 = vmov 0   ;;  %v115_v1 = vld [vmem:[%s572_s2 + $0x78] sm:$0xff]  ;;  %v113_v2 = vld [vmem:[%s572_s2 + $0x68] sm:$0xff]  ;;  %s441_s28 = smov [#allocation5]  }
   0x7   :  { %384 = vset.pattern.permute.xlu2 %v440_v0  ;;  %383 = vset.pattern.permute.xlu1 %v440_v0  ;;  %v111_v3 = vld [vmem:[%s572_s2 + $0x58] sm:$0xff]  ;;  %v114_v4 = vld [vmem:[%s572_s2 + $0x70] sm:$0xff]  ;;  %v112_v5 = vld [vmem:[%s572_s2 + $0x60] sm:$0xff]  ;;  %s363_s29 = sshll.u32 %s441_s28, 4  ;;  %s364_s29 = int_to_ptr.vmem [resolvable:$true] %s363_s29 }
   0x8   :  { %382 = vset.pattern.permute.xlu0 %v440_v0  ;;  %183 = vperm.xlu1 %383, %v113_v2   ;;  %v110_v6 = vld [vmem:[%s572_s2 + $0x50] sm:$0xff]  ;;  %v109_v7 = vld [vmem:[%s572_s2 + $0x48] sm:$0xff]  ;;  %v108_v8 = vld [vmem:[%s572_s2 + $0x40] sm:$0xff] }
   0x9   :  { %193 = vperm.xlu0 %382, %v115_v1   ;;  %173 = vperm.xlu2 %384, %v111_v3   ;;  %v107_v9 = vld [vmem:[%s572_s2 + $0x38] sm:$0xff]  ;;  %v106_v10 = vld [vmem:[%s572_s2 + $0x30] sm:$0xff]  ;;  %v105_v11 = vld [vmem:[%s572_s2 + $0x28] sm:$0xff] }
   0xa   :  { %v104_v12 = vld [vmem:[%s572_s2 + $0x20] sm:$0xff]  ;;  %v103_v13 = vld [vmem:[%s572_s2 + $0x18] sm:$0xff]  ;;  %v102_v14 = vld [vmem:[%s572_s2 + $0x10] sm:$0xff] }
   0xb   :  { %v101_v15 = vld [vmem:[%s572_s2 + $0x8] sm:$0xff]  ;;  %v100_v16 = vld [vmem:[%s572_s2] sm:$0xff]  ;;  %v97_v26 = vld [vmem:[#allocation2 + $0x1f0] sm:$0xff] }
   0xc   :  { %v521_v18 = vld [vmem:[%s573_s3] sm:$0x77]  ;;  %v98_v27 = vld [vmem:[#allocation2 + $0x1f8] sm:$0xff]  ;;  %v64_v30 = vld [vmem:[#allocation2 + $0xf0] sm:$0xff] }
   0xd   :  { %v197_v19 = vperm.slane %v521_v18, 2  ;;  %v198_v20 = vperm.slane %v521_v18, 6  ;;  %v65_v31 = vld [vmem:[#allocation2 + $0xf8] sm:$0xff]  ;;  %v95_v40 = vld [vmem:[#allocation2 + $0x1e0] sm:$0xff]  ;;  %v96_v41 = vld [vmem:[#allocation2 + $0x1e8] sm:$0xff] }
   0xe   :  { %v93_v42 = vld [vmem:[#allocation2 + $0x1d0] sm:$0xff]  ;;  %v94_v47 = vld [vmem:[#allocation2 + $0x1d8] sm:$0xff]  ;;  %v62_v49 = vld [vmem:[#allocation2 + $0xe0] sm:$0xff] }
   0xf   :  { %v525_v21 = vperm.slane %v197_v19, 2  ;;  %v527_v22 = vperm.slane %v198_v20, 2  ;;  %v63_v50 = vld [vmem:[#allocation2 + $0xe8] sm:$0xff]  ;;  %v91_v51 = vld [vmem:[#allocation2 + $0x1c0] sm:$0xff]  ;;  %v60_v59 = vld [vmem:[#allocation2 + $0xd0] sm:$0xff] }
  0x10   :  { %178 = vperm.xlu1 %383, %v112_v5   ;;  %v92_v56 = vld [vmem:[#allocation2 + $0x1c8] sm:$0xff]  ;;  %v89_v61 = vld [vmem:[#allocation2 + $0x1b0] sm:$0xff]  ;;  %v61_v0 = vld [vmem:[#allocation2 + $0xd8] sm:$0xff] }
  0x11   :  { %188 = vperm.xlu0 %382, %v114_v4   ;;  %168 = vperm.xlu2 %384, %v110_v6   ;;  %v90_v2 = vld [vmem:[#allocation2 + $0x1b8] sm:$0xff]  ;;  %v87_v3 = vld [vmem:[#allocation2 + $0x1a0] sm:$0xff] }
  0x12   :  { %v58_v5 = vld [vmem:[#allocation2 + $0xc0] sm:$0xff] }
  0x18   :  { %158 = vperm.xlu1 %383, %v108_v8   ;;  %v59_v8 = vld [vmem:[#allocation2 + $0xc8] sm:$0xff] }
  0x19   :  { %163 = vperm.xlu0 %382, %v109_v7   ;;  %153 = vperm.xlu2 %384, %v107_v9  }
  0x20   :  { %143 = vperm.xlu1 %383, %v105_v11  }
  0x21   :  { %148 = vperm.xlu0 %382, %v106_v10   ;;  %138 = vperm.xlu2 %384, %v104_v12   ;;  %v88_v10 = vld [vmem:[#allocation2 + $0x1a8] sm:$0xff] }
  0x28   :  { %128 = vperm.xlu1 %383, %v102_v14   ;;  %v56_v14 = vld [vmem:[#allocation2 + $0xb0] sm:$0xff] }
  0x29   :  { %133 = vperm.xlu0 %382, %v103_v13   ;;  %123 = vperm.xlu2 %384, %v101_v15  }
  0x31   :  { %118 = vperm.xlu0 %382, %v100_v16  }
  0x63   :  { %v174_v17 = vpop.permute.xlu2 %173 }
  0x64   :  { %v225_v52 = vmul.f32 %v525_v21, %v174_v17  ;;  %v226_v57 = vmul.f32 %v527_v22, %v174_v17  ;;  %v85_v17 = vld [vmem:[#allocation2 + $0x190] sm:$0xff] }
  0x66   :  { %v257_v9 = vmul.f32 %v225_v52, %v89_v61  ;;  %v258_v15 = vmul.f32 %v226_v57, %v90_v2  ;;  %v51_v52 = vld [vmem:[#allocation2 + $0x88] sm:$0xff] }
  0x67   :  { %v80_v61 = vld [vmem:[#allocation2 + $0x168] sm:$0xff] }
  0x6b   :  { %v169_v23 = vpop.permute.xlu2 %168 }
  0x6c   :  { %v223_v58 = vmul.f32 %v525_v21, %v169_v23  ;;  %v224_v4 = vmul.f32 %v527_v22, %v169_v23 }
  0x6e   :  { %v255_v16 = vmul.f32 %v223_v58, %v87_v3  ;;  %v49_v3 = vld [vmem:[#allocation2 + $0x78] sm:$0xff] }
  0x73   :  { %v154_v43 = vpop.permute.xlu2 %153 }
  0x7a   :  { %v184_v25 = vpop.permute.xlu1 %183 }
  0x7b   :  { %v194_v24 = vpop.permute.xlu0 %193  ;;  %v229_v36 = vmul.f32 %v525_v21, %v184_v25  ;;  %v230_v37 = vmul.f32 %v527_v22, %v184_v25  ;;  %v57_v25 = vld [vmem:[#allocation2 + $0xb8] sm:$0xff] }
  0x7c   :  { %v233_v28 = vmul.f32 %v525_v21, %v194_v24  ;;  %v234_v29 = vmul.f32 %v527_v22, %v194_v24 }
  0x7d   :  { %v261_v55 = vmul.f32 %v229_v36, %v93_v42  ;;  %v262_v60 = vmul.f32 %v230_v37, %v94_v47  ;;  %v84_v37 = vld [vmem:[#allocation2 + $0x188] sm:$0xff]  ;;  %v50_v47 = vld [vmem:[#allocation2 + $0x80] sm:$0xff] }
  0x7e   :  { %v265_v32 = vmul.f32 %v233_v28, %v97_v26  ;;  %v266_v33 = vmul.f32 %v234_v29, %v98_v27  ;;  %v86_v26 = vld [vmem:[#allocation2 + $0x198] sm:$0xff]  ;;  %v83_v27 = vld [vmem:[#allocation2 + $0x180] sm:$0xff] }
  0x7f   :  { %v293_v7 = vadd.f32 %v261_v55, %v60_v59  ;;  %v294_v13 = vadd.f32 %v262_v60, %v61_v0  ;;  %v79_v60 = vld [vmem:[#allocation2 + $0x160] sm:$0xff] }
  0x80   :  { %v297_v34 = vadd.f32 %v265_v32, %v64_v30  ;;  %v298_v35 = vadd.f32 %v266_v33, %v65_v31  ;;  %v54_v30 = vld [vmem:[#allocation2 + $0xa0] sm:$0xff]  ;;  %v256_v31 = vmul.f32 %v224_v4, %v88_v10  ;;  %v217_v32 = vmul.f32 %v525_v21, %v154_v43  ;;  %v139_v33 = vpop.permute.xlu2 %138  ;;  %v78_v4 = vld [vmem:[#allocation2 + $0x158] sm:$0xff] }
  0x82   :  { %316 = vmatpush.msra.mxu0 %v297_v34  ;;  %336 = vmatpush.msra.mxu1 %v298_v35  ;;  %v179_v39 = vpop.permute.xlu1 %178  ;;  %v289_v34 = vadd.f32 %v257_v9, %v56_v14  ;;  %v55_v35 = vld [vmem:[#allocation2 + $0xa8] sm:$0xff] }
  0x83   :  { %v189_v38 = vpop.permute.xlu0 %188  ;;  %v227_v46 = vmul.f32 %v525_v21, %v179_v39  ;;  %v228_v48 = vmul.f32 %v527_v22, %v179_v39  ;;  %v290_v39 = vadd.f32 %v258_v15, %v57_v25  ;;  %v47_v9 = vld [vmem:[#allocation2 + $0x68] sm:$0xff]  ;;  %v45_v25 = vld [vmem:[#allocation2 + $0x58] sm:$0xff] }
  0x84   :  { %v231_v44 = vmul.f32 %v525_v21, %v189_v38  ;;  %v232_v45 = vmul.f32 %v527_v22, %v189_v38  ;;  %v218_v38 = vmul.f32 %v527_v22, %v154_v43  ;;  %v211_v43 = vmul.f32 %v525_v21, %v139_v33  ;;  %v76_v14 = vld [vmem:[#allocation2 + $0x148] sm:$0xff] }
  0x85   :  { %v259_v1 = vmul.f32 %v227_v46, %v91_v51  ;;  %v260_v6 = vmul.f32 %v228_v48, %v92_v56  ;;  %v53_v46 = vld [vmem:[#allocation2 + $0x98] sm:$0xff] }
  0x86   :  { %v263_v53 = vmul.f32 %v231_v44, %v95_v40  ;;  %v264_v54 = vmul.f32 %v232_v45, %v96_v41  ;;  %v52_v40 = vld [vmem:[#allocation2 + $0x90] sm:$0xff]  ;;  %v287_v45 = vadd.f32 %v255_v16, %v54_v30  ;;  %v82_v48 = vld [vmem:[#allocation2 + $0x178] sm:$0xff]  ;;  %v43_v30 = vld [vmem:[#allocation2 + $0x48] sm:$0xff] }
  0x87   :  { %v291_v24 = vadd.f32 %v259_v1, %v58_v5  ;;  %v292_v29 = vadd.f32 %v260_v6, %v59_v8  ;;  %v81_v44 = vld [vmem:[#allocation2 + $0x170] sm:$0xff]  ;;  %v250_v59 = vmul.f32 %v218_v38, %v82_v48  ;;  %v75_v5 = vld [vmem:[#allocation2 + $0x140] sm:$0xff]  ;;  %v212_v6 = vmul.f32 %v527_v22, %v139_v33 }
  0x88   :  { %v295_v62 = vadd.f32 %v263_v53, %v62_v49  ;;  %v296_v63 = vadd.f32 %v264_v54, %v63_v50  ;;  %v288_v49 = vadd.f32 %v256_v31, %v55_v35  ;;  %v48_v53 = vld [vmem:[#allocation2 + $0x70] sm:$0xff]  ;;  %v249_v54 = vmul.f32 %v217_v32, %v81_v44  ;;  %v46_v8 = vld [vmem:[#allocation2 + $0x60] sm:$0xff]  ;;  %v72_v35 = vld [vmem:[#allocation2 + $0x128] sm:$0xff] }
  0x89   :  { %v282_v15 = vadd.f32 %v250_v59, %v49_v3  ;;  %v44_v16 = vld [vmem:[#allocation2 + $0x50] sm:$0xff] }
  0x8a   :  { %317 = vmatpush.msra.mxu0 %v295_v62  ;;  %337 = vmatpush.msra.mxu1 %v296_v63  ;;  %v159_v12 = vpop.permute.xlu1 %158  ;;  %v77_v62 = vld [vmem:[#allocation2 + $0x150] sm:$0xff]  ;;  %v281_v10 = vadd.f32 %v249_v54, %v48_v53 }
  0x8b   :  { %v164_v11 = vpop.permute.xlu0 %163  ;;  %v219_v23 = vmul.f32 %v525_v21, %v159_v12  ;;  %v220_v28 = vmul.f32 %v527_v22, %v159_v12  ;;  %v73_v38 = vld [vmem:[#allocation2 + $0x130] sm:$0xff] }
  0x8c   :  { %v221_v19 = vmul.f32 %v525_v21, %v164_v11  ;;  %v222_v20 = vmul.f32 %v527_v22, %v164_v11  ;;  %318 = vmatpush.msra.mxu0 %v293_v7  ;;  %338 = vmatpush.msra.mxu1 %v294_v13  ;;  %v40_v48 = vld [vmem:[#allocation2 + $0x30] sm:$0xff] }
  0x8d   :  { %v251_v42 = vmul.f32 %v219_v23, %v83_v27  ;;  %v252_v50 = vmul.f32 %v220_v28, %v84_v37  ;;  %v244_v27 = vmul.f32 %v212_v6, %v76_v14  ;;  %v71_v28 = vld [vmem:[#allocation2 + $0x120] sm:$0xff]  ;;  %v36_v59 = vld [vmem:[#allocation2 + $0x10] sm:$0xff] }
  0x8e   :  { %319 = vmatpush.msra.mxu0 %v291_v24  ;;  %v253_v36 = vmul.f32 %v221_v19, %v85_v17  ;;  %339 = vmatpush.msra.mxu1 %v292_v29  ;;  %v254_v41 = vmul.f32 %v222_v20, %v86_v26  ;;  %v243_v19 = vmul.f32 %v211_v43, %v75_v5  ;;  %v124_v20 = vpop.permute.xlu2 %123  ;;  %v42_v26 = vld [vmem:[#allocation2 + $0x40] sm:$0xff] }
  0x8f   :  { %v283_v58 = vadd.f32 %v251_v42, %v50_v47  ;;  %v284_v7 = vadd.f32 %v252_v50, %v51_v52  ;;  %v205_v31 = vmul.f32 %v525_v21, %v124_v20  ;;  %v206_v32 = vmul.f32 %v527_v22, %v124_v20  ;;  %v38_v43 = vld [vmem:[#allocation2 + $0x20] sm:$0xff] }
  0x90   :  { %320 = vmatpush.msra.mxu0 %v289_v34  ;;  %340 = vmatpush.msra.mxu1 %v290_v39  ;;  %v285_v51 = vadd.f32 %v253_v36, %v52_v40  ;;  %v286_v57 = vadd.f32 %v254_v41, %v53_v46  ;;  %v275_v37 = vadd.f32 %v243_v19, %v42_v26  ;;  %v74_v39 = vld [vmem:[#allocation2 + $0x138] sm:$0xff]  ;;  %v69_v40 = vld [vmem:[#allocation2 + $0x110] sm:$0xff]  ;;  %v34_v6 = vld [vmem:[#allocation2] sm:$0xff] }
  0x91   :  { %v70_v46 = vld [vmem:[#allocation2 + $0x118] sm:$0xff]  ;;  %v276_v47 = vadd.f32 %v244_v27, %v43_v30  ;;  %v237_v54 = vmul.f32 %v205_v31, %v69_v40 }
  0x92   :  { %321 = vmatpush.msra.mxu0 %v287_v45  ;;  %341 = vmatpush.msra.mxu1 %v288_v49  ;;  %v144_v56 = vpop.permute.xlu1 %143  ;;  %v41_v49 = vld [vmem:[#allocation2 + $0x38] sm:$0xff] }
  0x93   :  { %v149_v55 = vpop.permute.xlu0 %148  ;;  %v213_v1 = vmul.f32 %v525_v21, %v144_v56  ;;  %v214_v2 = vmul.f32 %v527_v22, %v144_v56  ;;  %v238_v56 = vmul.f32 %v206_v32, %v70_v46 }
  0x94   :  { %v215_v63 = vmul.f32 %v525_v21, %v149_v55  ;;  %v216_v0 = vmul.f32 %v527_v22, %v149_v55  ;;  %322 = vmatpush.msra.mxu0 %v285_v51  ;;  %342 = vmatpush.msra.mxu1 %v286_v57  ;;  %v39_v55 = vld [vmem:[#allocation2 + $0x28] sm:$0xff] }
  0x95   :  { %v245_v13 = vmul.f32 %v213_v1, %v77_v62  ;;  %v246_v17 = vmul.f32 %v214_v2, %v78_v4  ;;  %v68_v1 = vld [vmem:[#allocation2 + $0x108] sm:$0xff]  ;;  %v269_v2 = vadd.f32 %v237_v54, %v36_v59 }
  0x96   :  { %323 = vmatpush.msra.mxu0 %v283_v58  ;;  %v247_v11 = vmul.f32 %v215_v63, %v79_v60  ;;  %v248_v12 = vmul.f32 %v216_v0, %v80_v61  ;;  %343 = vmatpush.msra.mxu1 %v284_v7  ;;  %v37_v60 = vld [vmem:[#allocation2 + $0x18] sm:$0xff]  ;;  %v67_v0 = vld [vmem:[#allocation2 + $0x100] sm:$0xff]  ;;  %v35_v7 = vld [vmem:[#allocation2 + $0x8] sm:$0xff] }
  0x97   :  { %v277_v29 = vadd.f32 %v245_v13, %v44_v16  ;;  %v278_v36 = vadd.f32 %v246_v17, %v45_v25  ;;  %v270_v5 = vadd.f32 %v238_v56, %v37_v60 }
  0x98   :  { %324 = vmatpush.msra.mxu0 %v281_v10  ;;  %v279_v23 = vadd.f32 %v247_v11, %v46_v8  ;;  %v280_v24 = vadd.f32 %v248_v12, %v47_v9  ;;  %344 = vmatpush.msra.mxu1 %v282_v15  ;;  %v308_v12 = vld [vmem:[%s570_s0] sm:$0xff]  ;;  %s365_s0 = sshll.u32 %s574_s4, 4  ;;  %s366_s0 = int_to_ptr.hbm [resolvable:$true] %s365_s0 }
  0x9a   :  { %325 = vmatpush.msra.mxu0 %v279_v23  ;;  %345 = vmatpush.msra.mxu1 %v280_v24  ;;  %v129_v34 = vpop.permute.xlu1 %128 }
  0x9b   :  { %v134_v33 = vpop.permute.xlu0 %133  ;;  %v207_v44 = vmul.f32 %v525_v21, %v129_v34  ;;  %v208_v45 = vmul.f32 %v527_v22, %v129_v34 }
  0x9c   :  { %v209_v41 = vmul.f32 %v525_v21, %v134_v33  ;;  %v210_v42 = vmul.f32 %v527_v22, %v134_v33  ;;  %326 = vmatpush.msra.mxu0 %v277_v29  ;;  %346 = vmatpush.msra.mxu1 %v278_v36 }
  0x9d   :  { %v239_v50 = vmul.f32 %v207_v44, %v71_v28  ;;  %v240_v51 = vmul.f32 %v208_v45, %v72_v35 }
  0x9e   :  { %327 = vmatpush.msra.mxu0 %v275_v37  ;;  %v241_v52 = vmul.f32 %v209_v41, %v73_v38  ;;  %v242_v53 = vmul.f32 %v210_v42, %v74_v39  ;;  %347 = vmatpush.msra.mxu1 %v276_v47 }
  0x9f   :  { %v271_v61 = vadd.f32 %v239_v50, %v38_v43  ;;  %v272_v62 = vadd.f32 %v240_v51, %v39_v55 }
  0xa0   :  { %v273_v57 = vadd.f32 %v241_v52, %v40_v48  ;;  %v274_v58 = vadd.f32 %v242_v53, %v41_v49 }
  0xa2   :  { %328 = vmatpush.msra.mxu0 %v273_v57  ;;  %348 = vmatpush.msra.mxu1 %v274_v58 }
  0xa3   :  { %v119_v63 = vpop.permute.xlu0 %118 }
  0xa4   :  { %v203_v3 = vmul.f32 %v525_v21, %v119_v63  ;;  %v204_v4 = vmul.f32 %v527_v22, %v119_v63  ;;  %329 = vmatpush.msra.mxu0 %v271_v61  ;;  %349 = vmatpush.msra.mxu1 %v272_v62  ;;  %v375_v21 = vrot.slane %v521_v18, 9 }
  0xa6   :  { %v235_v8 = vmul.f32 %v203_v3, %v67_v0  ;;  %v236_v9 = vmul.f32 %v204_v4, %v68_v1  ;;  %330 = vmatpush.msra.mxu0 %v269_v2  ;;  %350 = vmatpush.msra.mxu1 %v270_v5  ;;  %v302_v22 = vmul.f32 %v375_v21, %v521_v18 }
  0xa8   :  { %v267_v10 = vadd.f32 %v235_v8, %v34_v6  ;;  %v268_v11 = vadd.f32 %v236_v9, %v35_v7  ;;  %v376_v13 = vrot.slane %v302_v22, 9 }
  0xaa   :  { %331 = vmatpush.msra.mxu0 %v267_v10  ;;  %351 = vmatpush.msra.mxu1 %v268_v11  ;;  %v307_v14 = vadd.f32 %v376_v13, %v521_v18 }
  0xab   :  { %332 = vmatmul.f32.vlgmr.msra.gmra.mxu0 %v308_v12  ;;  %352 = vmatmul.f32.vlgmr.msra.gmra.mxu1 %v308_v12 }
  0xac   :  { %v310_v15 = vperm.slane %v307_v14, 0  ;;  %v311_v16 = vperm.slane %v307_v14, 4 }
  0xae   :  { %v314_v17 = vperm.slane %v310_v15, 0  ;;  %v315_v19 = vperm.slane %v311_v16, 0 }
 0x128   :  { %v333_v20 = vpop.f32.mrf.mxu0  ;;  %v353_v23 = vpop.f32.mrf.mxu1 }
 0x129   :  { %v334_v24 = vadd.f32 %v333_v20, %v314_v17  ;;  %v354_v25 = vadd.f32 %v353_v23, %v315_v19 }
 0x12b   :  { %356 = vst [vmem:[#allocation5] sm:$0xff] %v334_v24 }
 0x12c   :  { %357 = vst [vmem:[#allocation5 + $0x8] sm:$0xff] %v354_v25 }
 0x12d   :  { %368 = dma.vmem_to_hbm [thread:$0]  %s364_s29, 256, %s366_s0, [#allocation4]  }
 0x12e   :  { %435 = dma.done.wait [#allocation4], 256  }
 0x12f   :  { %436 = vsyncadd [#allocation4], 4294967040 }
 0x130   :  { %373 = vsyncpa [#allocation3], 1 }
 0x131   :  { %374 = vsyncpa [#allocation4], 1 }

</bundles_post_ra>
